<compile_context>
chip_gen: v6e
topology: v6e:2x2x1
jax: 0.10.0
libtpu: 0.0.40
codegen_flags: <defaults>
</compile_context>

<pallas_src>
import jax
import jax.numpy as jnp
from jax.experimental import pallas as pl
from jax.experimental.pallas import tpu as pltpu

_SELU_ALPHA = 1.6732632423543772
_SELU_SCALE = 1.0507009873554805
_BN_EPS = 1e-5
_LANE = 128
_SUBLANE = 8


def _round_up(n, m):
    return ((n + m - 1) // m) * m


def _pad2(a, rows, cols):
    return jnp.pad(a, ((0, rows - a.shape[0]), (0, cols - a.shape[1])))


def _vmem_limit_bytes(stream_tile_bytes, resident_bytes):
    # double-buffered streaming tiles + resident operands/intermediates, 2x headroom
    need = 2 * stream_tile_bytes + resident_bytes
    return int(min(max(2 * need, 16 << 20), 64 << 20))


def _make_stats_kernel(tile_m, batch):
    """Pass 1: accumulate per-feature sum(h) and sum(h*h) over the true batch."""

    def kernel(x_ref, w1_ref, b1_ref, sum_ref, sumsq_ref):
        i = pl.program_id(0)

        @pl.when(i == 0)
        def _():
            sum_ref[...] = jnp.zeros_like(sum_ref)
            sumsq_ref[...] = jnp.zeros_like(sumsq_ref)

        # bf16 x bf16 -> f32 on the MXU
        h = jnp.dot(x_ref[...], w1_ref[...], preferred_element_type=jnp.float32)
        h = h + b1_ref[...]

        # Mask padded batch rows so they do not pollute the BN statistics.
        row = jax.lax.broadcasted_iota(jnp.int32, (tile_m, 1), 0) + i * tile_m
        h = jnp.where(row < batch, h, 0.0)

        # One-pass statistics: sum and sum of squares together.
        sum_ref[...] += jnp.sum(h, axis=0, keepdims=True)
        sumsq_ref[...] += jnp.sum(h * h, axis=0, keepdims=True)

    return kernel


def _fwd_kernel(x_ref, w1_ref, b1_ref, scale_ref, shift_ref, w2_ref, b2_ref, o_ref):
    """Pass 2: h -> folded BN -> SELU -> Linear -> sigmoid, per batch tile."""
    h = jnp.dot(x_ref[...], w1_ref[...], preferred_element_type=jnp.float32)
    h = h + b1_ref[...]

    # Folded BatchNorm: scale = gamma * rsqrt(var + eps), shift = beta - mean*scale
    h = h * scale_ref[...] + shift_ref[...]

    # SELU (f32 elementwise; exp goes to the EUP)
    h = _SELU_SCALE * jnp.where(h > 0, h, _SELU_ALPHA * (jnp.exp(h) - 1.0))

    # Dropout(p=0.0) is the identity.
    # TODO(synk): stochastic dropout (p > 0) would need pltpu.prng_* in-kernel.

    out = jnp.dot(h.astype(w2_ref.dtype), w2_ref[...],
                  preferred_element_type=jnp.float32)
    out = out + b2_ref[...]

    # Sigmoid: divide on the EUP (vrcp) instead of VALU.
    o_ref[...] = pl.reciprocal(1.0 + jnp.exp(-out), approx=True).astype(o_ref.dtype)


def bernoulli_decoder_a(x, params, *, tile_m=512, matmul_dtype=jnp.bfloat16):
    """x: [B, n_input] float32 -> means: [B, n_output] float32."""
    w1, b1, gamma, beta, w2, b2 = (
        params["w1"], params["b1"], params["gamma"],
        params["beta"], params["w2"], params["b2"],
    )
    B, n_input = x.shape
    n_middle = w1.shape[1]
    n_output = w2.shape[1]

    # Lane-dense feature padding and batch tiling.
    Kp = _round_up(n_input, _LANE)
    Mp = _round_up(n_middle, _LANE)
    Np = _round_up(n_output, _LANE)
    TM = max(_SUBLANE, min(tile_m, _round_up(B, _SUBLANE)))
    Bp = _round_up(B, TM)
    nb = Bp // TM
    itemsize = jnp.dtype(matmul_dtype).itemsize

    # Zero-padded operands (padding contributes exactly 0 to real outputs).
    x_p = _pad2(x, Bp, Kp).astype(matmul_dtype)
    w1_p = _pad2(w1, Kp, Mp).astype(matmul_dtype)
    w2_p = _pad2(w2, Mp, Np).astype(matmul_dtype)
    b1_p = _pad2(b1, 1, Mp).astype(jnp.float32)
    b2_p = _pad2(b2, 1, Np).astype(jnp.float32)
    gamma_p = _pad2(gamma, 1, Mp).astype(jnp.float32)
    beta_p = _pad2(beta, 1, Mp).astype(jnp.float32)

    resident_w = lambda blk: pl.BlockSpec(blk, lambda i: (0, 0))

    # ---- Pass 1: BN statistics (accumulator output, "arbitrary" grid axis) ----
    vmem1 = _vmem_limit_bytes(
        TM * Kp * itemsize,
        Kp * Mp * itemsize + 3 * Mp * 4 + TM * Mp * 4,
    )
    h_sum, h_sumsq = pl.pallas_call(
        _make_stats_kernel(TM, B),
        grid=(nb,),
        in_specs=[
            pl.BlockSpec((TM, Kp), lambda i: (i, 0)),   # x tile (streamed)
            resident_w((Kp, Mp)),                       # w1 (resident)
            resident_w((1, Mp)),                        # b1 (resident)
        ],
        out_specs=(
            pl.BlockSpec((1, Mp), lambda i: (0, 0)),    # sum   (resident acc)
            pl.BlockSpec((1, Mp), lambda i: (0, 0)),    # sumsq (resident acc)
        ),
        out_shape=(
            jax.ShapeDtypeStruct((1, Mp), jnp.float32),
            jax.ShapeDtypeStruct((1, Mp), jnp.float32),
        ),
        compiler_params=pltpu.CompilerParams(
            dimension_semantics=("arbitrary",),
            vmem_limit_bytes=vmem1,
        ),
    )(x_p, w1_p, b1_p)

    # ---- Fold BN stats + affine into scale/shift (tiny [1, Mp] XLA ops) ----
    mean = h_sum / B
    var = jnp.maximum(h_sumsq / B - mean * mean, 0.0)   # biased var (PyTorch BN)
    inv_std = jax.lax.rsqrt(var + _BN_EPS)
    scale = gamma_p * inv_std
    shift = beta_p - mean * scale

    # ---- Pass 2: normalize + SELU + second Linear + sigmoid ----
    vmem2 = _vmem_limit_bytes(
        TM * Kp * itemsize + TM * Np * 4,
        (Kp * Mp + Mp * Np) * itemsize + (3 * Mp + Np) * 4 + 2 * TM * Mp * 4,
    )
    cost = pl.CostEstimate(
        flops=2 * Bp * Kp * Mp + 2 * Bp * Mp * Np,
        transcendentals=Bp * (Mp + Np),
        bytes_accessed=(Bp * Kp + Kp * Mp + Mp * Np) * itemsize + Bp * Np * 4,
    )
    out_p = pl.pallas_call(
        _fwd_kernel,
        grid=(nb,),
        in_specs=[
            pl.BlockSpec((TM, Kp), lambda i: (i, 0)),   # x tile (streamed)
            resident_w((Kp, Mp)),                       # w1
            resident_w((1, Mp)),                        # b1
            resident_w((1, Mp)),                        # BN scale
            resident_w((1, Mp)),                        # BN shift
            resident_w((Mp, Np)),                       # w2
            resident_w((1, Np)),                        # b2
        ],
        out_specs=pl.BlockSpec((TM, Np), lambda i: (i, 0)),
        out_shape=jax.ShapeDtypeStruct((Bp, Np), jnp.float32),
        compiler_params=pltpu.CompilerParams(
            dimension_semantics=("parallel",),
            vmem_limit_bytes=vmem2,
        ),
        cost_estimate=cost,
    )(x_p, w1_p, b1_p, scale, shift, w2_p, b2_p)

    return out_p[:B, :n_output]


def init_params(key, n_input, n_output):
    """Deterministic synthetic parameter init (Kaiming-uniform-ish scale)."""
    n_middle = n_output
    k1, k2, k3, k4 = jax.random.split(key, 4)
    s1 = 1.0 / jnp.sqrt(n_input)
    s2 = 1.0 / jnp.sqrt(n_middle)
    return {
        # stored as [in, out] (transpose of PyTorch's [out, in])
        "w1": jax.random.uniform(k1, (n_input, n_middle), jnp.float32, -s1, s1),
        "b1": jax.random.uniform(k2, (1, n_middle), jnp.float32, -s1, s1),
        "gamma": jnp.ones((1, n_middle), jnp.float32),
        "beta": jnp.zeros((1, n_middle), jnp.float32),
        "w2": jax.random.uniform(k3, (n_middle, n_output), jnp.float32, -s2, s2),
        "b2": jax.random.uniform(k4, (1, n_output), jnp.float32, -s2, s2),
    }


def _reference(x, p):
    """Pure-JAX f32 reference for sanity checking."""
    h = x @ p["w1"] + p["b1"]
    mean = jnp.mean(h, axis=0, keepdims=True)
    var = jnp.mean((h - mean) ** 2, axis=0, keepdims=True)
    h = (h - mean) / jnp.sqrt(var + _BN_EPS) * p["gamma"] + p["beta"]
    h = _SELU_SCALE * jnp.where(h > 0, h, _SELU_ALPHA * (jnp.exp(h) - 1.0))
    out = h @ p["w2"] + p["b2"]
    return jax.nn.sigmoid(out)


if __name__ == "__main__":
    B, n_input, n_output = 8, 32, 16

    key = jax.random.PRNGKey(0)
    kx, kp = jax.random.split(key)
    x = jax.random.normal(kx, (B, n_input), jnp.float32)
    params = init_params(kp, n_input, n_output)

    out = bernoulli_decoder_a(x, params)
    out = jax.block_until_ready(out)

    ref = _reference(x, params)
    assert out.shape == (B, n_output)
    assert bool(jnp.all(jnp.isfinite(out)))
    # bf16 MXU operands -> ~1e-2-level deviation from the pure-f32 reference.
    assert jnp.allclose(out, ref, atol=3e-2, rtol=3e-2), \
        float(jnp.max(jnp.abs(out - ref)))

    print("KERNEL_OK")
</pallas_src>

<mosaic_0001>
module attributes {stable_mosaic.version = 11 : i64} {
  func.func @kernel(%arg0: i32, %arg1: memref<8x128xbf16, #tpu.memory_space<vmem>>, %arg2: memref<128x128xbf16, #tpu.memory_space<vmem>>, %arg3: memref<1x128xf32, #tpu.memory_space<vmem>>, %arg4: memref<1x128xf32, #tpu.memory_space<vmem>>, %arg5: memref<1x128xf32, #tpu.memory_space<vmem>>) attributes {dimension_semantics = [#tpu.dimension_semantics<arbitrary>], iteration_bounds = array<i64: 1>, scalar_prefetch = 0 : i64, scratch_operands = 0 : i64, tpu.core_type = #tpu.core_type<tc>, window_params = [{transform_indices = @transform_0, window_bounds = array<i64: 8, 128>}, {pipeline_mode = #tpu.pipeline_mode<synchronous>, transform_indices = @transform_1, window_bounds = array<i64: 128, 128>}, {pipeline_mode = #tpu.pipeline_mode<synchronous>, transform_indices = @transform_2, window_bounds = array<i64: 1, 128>}, {pipeline_mode = #tpu.pipeline_mode<synchronous>, transform_indices = @transform_3, window_bounds = array<i64: 1, 128>}, {pipeline_mode = #tpu.pipeline_mode<synchronous>, transform_indices = @transform_4, window_bounds = array<i64: 1, 128>}]} {
    %c0_i32 = arith.constant 0 : i32
    %0 = arith.cmpi eq, %arg0, %c0_i32 : i32
    %1 = arith.extui %0 : i1 to i32
    %c0_i32_0 = arith.constant 0 : i32
    %2 = arith.cmpi ne, %1, %c0_i32_0 : i32
    scf.if %2 {
      %cst_18 = arith.constant 0.000000e+00 : f32
      %30 = vector.broadcast %cst_18 : f32 to vector<1x128xf32>
      %c0_19 = arith.constant 0 : index
      %c0_20 = arith.constant 0 : index
      %31 = vector.load %arg4[%c0_19, %c0_20] : memref<1x128xf32, #tpu.memory_space<vmem>>, vector<1x128xf32>
      tpu.vector_store %arg4[%c0_19, %c0_20], %30 {strides = array<i32>} : memref<1x128xf32, #tpu.memory_space<vmem>>, vector<1x128xf32>,
      %cst_21 = arith.constant 0.000000e+00 : f32
      %32 = vector.broadcast %cst_21 : f32 to vector<1x128xf32>
      %c0_22 = arith.constant 0 : index
      %c0_23 = arith.constant 0 : index
      %33 = vector.load %arg5[%c0_22, %c0_23] : memref<1x128xf32, #tpu.memory_space<vmem>>, vector<1x128xf32>
      tpu.vector_store %arg5[%c0_22, %c0_23], %32 {strides = array<i32>} : memref<1x128xf32, #tpu.memory_space<vmem>>, vector<1x128xf32>,
    } else {
    }
    %c0 = arith.constant 0 : index
    %c0_1 = arith.constant 0 : index
    %3 = vector.load %arg1[%c0, %c0_1] : memref<8x128xbf16, #tpu.memory_space<vmem>>, vector<8x128xbf16>
    %c0_2 = arith.constant 0 : index
    %c0_3 = arith.constant 0 : index
    %4 = vector.load %arg2[%c0_2, %c0_3] : memref<128x128xbf16, #tpu.memory_space<vmem>>, vector<128x128xbf16>
    %cst = arith.constant dense<0.000000e+00> : vector<8x128xf32>
    %5 = tpu.matmul %3, %4, %cst {dimension_numbers = #tpu.dot_dimension_numbers<[1], [0], [0], [1], [0, 0, 1, 1], [], []>} : vector<8x128xbf16>, vector<128x128xbf16>, vector<8x128xf32> -> vector<8x128xf32>
    %c0_4 = arith.constant 0 : index
    %c0_5 = arith.constant 0 : index
    %6 = vector.load %arg3[%c0_4, %c0_5] : memref<1x128xf32, #tpu.memory_space<vmem>>, vector<1x128xf32>
    %7 = vector.broadcast %6 : vector<1x128xf32> to vector<8x128xf32>
    %8 = arith.addf %5, %7 : vector<8x128xf32>
    %9 = tpu.iota {dimensions = array<i32: 0>} : vector<8x1xi32>
    %c8_i32 = arith.constant 8 : i32
    %10 = arith.muli %arg0, %c8_i32 : i32
    %11 = vector.broadcast %10 : i32 to vector<8x1xi32>
    %12 = arith.addi %9, %11 : vector<8x1xi32>
    %c8_i32_6 = arith.constant 8 : i32
    %13 = vector.broadcast %c8_i32_6 : i32 to vector<8x1xi32>
    %14 = arith.cmpi slt, %12, %13 : vector<8x1xi32>
    %cst_7 = arith.constant 0.000000e+00 : f32
    %15 = vector.shape_cast %14 : vector<8x1xi1> to vector<8x1xi1>
    %16 = vector.broadcast %15 : vector<8x1xi1> to vector<8x128xi1>
    %17 = vector.broadcast %cst_7 : f32 to vector<8x128xf32>
    %18 = arith.select %16, %8, %17 : vector<8x128xi1>, vector<8x128xf32>
    %c0_8 = arith.constant 0 : index
    %c0_9 = arith.constant 0 : index
    %19 = vector.load %arg4[%c0_8, %c0_9] : memref<1x128xf32, #tpu.memory_space<vmem>>, vector<1x128xf32>
    %cst_10 = arith.constant dense<0.000000e+00> : vector<128xf32>
    %20 = vector.multi_reduction <add>, %18, %cst_10 [0] : vector<8x128xf32> to vector<128xf32>
    %21 = vector.shape_cast %20 : vector<128xf32> to vector<1x128xf32>
    %22 = arith.addf %19, %21 : vector<1x128xf32>
    %c0_11 = arith.constant 0 : index
    %c0_12 = arith.constant 0 : index
    %23 = vector.load %arg4[%c0_11, %c0_12] : memref<1x128xf32, #tpu.memory_space<vmem>>, vector<1x128xf32>
    tpu.vector_store %arg4[%c0_11, %c0_12], %22 {strides = array<i32>} : memref<1x128xf32, #tpu.memory_space<vmem>>, vector<1x128xf32>,
    %c0_13 = arith.constant 0 : index
    %c0_14 = arith.constant 0 : index
    %24 = vector.load %arg5[%c0_13, %c0_14] : memref<1x128xf32, #tpu.memory_space<vmem>>, vector<1x128xf32>
    %25 = arith.mulf %18, %18 : vector<8x128xf32>
    %cst_15 = arith.constant dense<0.000000e+00> : vector<128xf32>
    %26 = vector.multi_reduction <add>, %25, %cst_15 [0] : vector<8x128xf32> to vector<128xf32>
    %27 = vector.shape_cast %26 : vector<128xf32> to vector<1x128xf32>
    %28 = arith.addf %24, %27 : vector<1x128xf32>
    %c0_16 = arith.constant 0 : index
    %c0_17 = arith.constant 0 : index
    %29 = vector.load %arg5[%c0_16, %c0_17] : memref<1x128xf32, #tpu.memory_space<vmem>>, vector<1x128xf32>
    tpu.vector_store %arg5[%c0_16, %c0_17], %28 {strides = array<i32>} : memref<1x128xf32, #tpu.memory_space<vmem>>, vector<1x128xf32>,
    return
  }
  func.func @transform_0(%arg0: i32) -> (i32, i32) {
    %c0_i32 = arith.constant 0 : i32
    %c0_i32_0 = arith.constant 0 : i32
    return %arg0, %c0_i32 : i32, i32
  }
  func.func @transform_1(%arg0: i32) -> (i32, i32) {
    %c0_i32 = arith.constant 0 : i32
    %c0_i32_0 = arith.constant 0 : i32
    %c0_i32_1 = arith.constant 0 : i32
    return %c0_i32, %c0_i32_0 : i32, i32
  }
  func.func @transform_2(%arg0: i32) -> (i32, i32) {
    %c0_i32 = arith.constant 0 : i32
    %c0_i32_0 = arith.constant 0 : i32
    %c0_i32_1 = arith.constant 0 : i32
    return %c0_i32, %c0_i32_0 : i32, i32
  }
  func.func @transform_3(%arg0: i32) -> (i32, i32) {
    %c0_i32 = arith.constant 0 : i32
    %c0_i32_0 = arith.constant 0 : i32
    %c0_i32_1 = arith.constant 0 : i32
    return %c0_i32, %c0_i32_0 : i32, i32
  }
  func.func @transform_4(%arg0: i32) -> (i32, i32) {
    %c0_i32 = arith.constant 0 : i32
    %c0_i32_0 = arith.constant 0 : i32
    %c0_i32_1 = arith.constant 0 : i32
    return %c0_i32, %c0_i32_0 : i32, i32
  }
}

</mosaic_0001>

<bundles_post_ra>
// kernel: tpu_custom_call.1
= control target key start
LH: loop header
LB: loop body
LE: loop exit
PB: predicated region body
PF: predicated region fallthrough
CT: control target
= control target key end

     0   :  { %10 = vsyncpa [#allocation3], 0  ;;  %s411_s0 = inlined_call_operand.hbm [shape: bf16[8,128], index: 0, kind: input, shape index: {}]   ;;  %s412_s1 = inlined_call_operand.hbm [shape: bf16[128,128], index: 1, kind: input, shape index: {}]   ;;  %s413_s2 = inlined_call_operand.vmem [shape: f32[1,128], index: 2, kind: input, shape index: {}]   ;;  %s414_s3 = inlined_call_operand.hbm [shape: f32[1,128], index: 3, kind: output, shape index: {0}]   ;;  %s415_s4 = inlined_call_operand.hbm [shape: f32[1,128], index: 4, kind: output, shape index: {1}]  }
   0x1   :  { %11 = vsyncpa [#allocation6], 0 }
   0x2   :  { %12 = vsyncpa [#allocation4], 0 }
   0x3   :  { %13 = vsyncpa [#allocation9], 0  ;;  %s363_s15 = smov [#allocation2]   ;;  %s364_s17 = smov [#allocation5]  }
   0x4   :  { %s20_s16 = sshll.u32 %s363_s15, 4  ;;  %s29_s18 = sshll.u32 %s364_s17, 4  ;;  %s21_s16 = int_to_ptr.vmem [resolvable:$true] %s20_s16  ;;  %s30_s18 = int_to_ptr.vmem [resolvable:$true] %s29_s18 }
   0x5   :  { %s283_s19 = scalar_lea.vmem %s21_s16, 64  ;;  %p288_p1 = scmp.lt.s32.totalorder %s21_s16, %s21_s16 }
   0x6   :  { %p284_p0 = scmp.ne.s32.totalorder %s21_s16, %s283_s19  ;;  %p289_p2 = scmp.lt.s32.totalorder %s283_s19, %s283_s19 }
   0x8   :  { %p290_p3 = por %p289_p2, %p288_p1 }
   0xa   :  { %p291_p4 = pnand %p290_p3, %p284_p0 }
   0xc   :  { %294 = shalt.err (!%p291_p4)
}
   0xd   :  { %23 = dma.hbm_to_vmem [thread:$0]  %s411_s0, 64, %s21_s16, [#allocation3]  }
   0xe   :  { %s303_s22 = scalar_lea.vmem %s30_s18, 1024  ;;  %p308_p6 = scmp.lt.s32.totalorder %s30_s18, %s30_s18 }
   0xf   :  { %p304_p5 = scmp.ne.s32.totalorder %s30_s18, %s303_s22  ;;  %p309_p7 = scmp.lt.s32.totalorder %s303_s22, %s303_s22 }
  0x11   :  { %p310_p8 = por %p309_p7, %p308_p6 }
  0x13   :  { %p311_p9 = pnand %p310_p8, %p304_p5 }
  0x15   :  { %314 = shalt.err (!%p311_p9)
}
  0x16   :  { %s365_s23 = smov 64   ;;  %s366_s24 = smov 4  }
  0x17   :  { %35 = dma.hbm_to_vmem [thread:$0]  %s412_s1, 1024, %s30_s18, [#allocation6], %s365_s23, %s365_s23, %s366_s24  }
  0x18   :  { %355 = dma.done.wait [#allocation3], 64  }
  0x19   :  { %356 = vsyncadd [#allocation3], 4294967232 }
  0x1a   :  { %357 = dma.done.wait [#allocation6], 1024  }
  0x1b   :  { %358 = vsyncadd [#allocation6], 4294966272  ;;  %v367_v0 = vmov 0.0   ;;  %vm368_vm0 = vmmov 0   ;;  %v267_v1 = vld [vmem:[#allocation5 + $0x38] sm:$0xff]   ;;  %v268_v2 = vld [vmem:[#allocation5 + $0x30] sm:$0xff]  }
  0x1c   :  { %239 = vmatprep.subr.bf16.mxu0 %v367_v0  ;;  %49 = vst [vmem:[#allocation7] sm:$0x1] %v367_v0  ;;  %50 = vst [vmem:[#allocation8] sm:$0x1] %v367_v0  ;;  %255 = vmatprep.mubr.msk.bf16.mxu0 %vm368_vm0, %v367_v0  ;;  %v269_v3 = vld [vmem:[#allocation5 + $0x28] sm:$0xff]   ;;  %v270_v4 = vld [vmem:[#allocation5 + $0x20] sm:$0xff]  }
  0x1d   :  { %240 = vmatpush3.bf16.msra.mxu0 %v267_v1  ;;  %v271_v5 = vld [vmem:[#allocation5 + $0x18] sm:$0xff]   ;;  %v272_v6 = vld [vmem:[#allocation5 + $0x10] sm:$0xff]   ;;  %v273_v7 = vld [vmem:[#allocation5 + $0x8] sm:$0xff]   ;;  %s369_s27 = smov [#allocation7]  }
  0x1e   :  { %241 = vmatprep.subr.bf16.mxu0 %v367_v0  ;;  %v274_v8 = vld [vmem:[#allocation5] sm:$0xff]   ;;  %v51_v9 = vld [vmem:[#allocation2] sm:$0xf]  ;;  %s197_s28 = sshll.u32 %s369_s27, 4  ;;  %s198_s28 = int_to_ptr.vmem [resolvable:$true] %s197_s28 }
  0x1f   :  { %v221_v10 = vld [vmem:[%s413_s2] ss:$0 sm:$0xff]  ;;  %s370_s2 = smov [#allocation8]   ;;  %s315_s30 = scalar_lea.vmem %s198_s28, 16 }
  0x20   :  { %s207_s29 = sshll.u32 %s370_s2, 4  ;;  %p316_p10 = scmp.ne.s32.totalorder %s198_s28, %s315_s30  ;;  %s208_s29 = int_to_ptr.vmem [resolvable:$true] %s207_s29 }
  0x21   :  { %242 = vmatpush3.bf16.msra.mxu0 %v268_v2  ;;  %s319_s5 = scalar_lea.vmem %s198_s28, 32  ;;  %p320_p11 = scmp.lt.s32.totalorder %s198_s28, %s198_s28 }
  0x22   :  { %243 = vmatprep.subr.bf16.mxu0 %v367_v0  ;;  %p321_p12 = scmp.lt.s32.totalorder %s319_s5, %s315_s30 }
  0x23   :  { %v172_v26 = vld [vmem:[#allocation7] sm:$0x1]  ;;  %v181_v29 = vld [vmem:[#allocation8] sm:$0x1] }
  0x24   :  { %p322_p13 = por %p321_p12, %p320_p11 }
  0x25   :  { %244 = vmatpush3.bf16.msra.mxu0 %v269_v3 }
  0x26   :  { %245 = vmatprep.subr.bf16.mxu0 %v367_v0  ;;  %p323_p0 = pnand %p322_p13, %p316_p10 }
  0x29   :  { %246 = vmatpush3.bf16.msra.mxu0 %v270_v4 }
  0x2a   :  { %247 = vmatprep.subr.bf16.mxu0 %v367_v0 }
  0x2d   :  { %248 = vmatpush3.bf16.msra.mxu0 %v271_v5 }
  0x2e   :  { %249 = vmatprep.subr.bf16.mxu0 %v367_v0 }
  0x31   :  { %250 = vmatpush3.bf16.msra.mxu0 %v272_v6 }
  0x32   :  { %251 = vmatprep.subr.bf16.mxu0 %v367_v0 }
  0x35   :  { %252 = vmatpush3.bf16.msra.mxu0 %v273_v7 }
  0x36   :  { %253 = vmatprep.subr.bf16.mxu0 %v367_v0 }
  0x39   :  { %254 = vmatpush3.bf16.msra.mxu0 %v274_v8 }
  0x3c   :  { %256 = vmatmul.mubr.bf16.vlgmr.msra.gmra.mxu0 %v51_v9 }
  0xfc   :  { %v157_v11 = vpop.f32.mrf.mxu0 }
  0xfd   :  { %v158_v12 = vadd.f32 %v221_v10, %v157_v11 }
  0xfe   :  { %v257_v13 = vpop.f32.mrf.mxu0 }
  0xff   :  { %v173_v14 = vrot.slane %v158_v12, 4  ;;  %v182_v15 = vmul.f32 %v158_v12, %v158_v12 }
 0x100   :  { %v160_v16 = vpop.f32.mrf.mxu0 }
 0x101   :  { %v174_v17 = vadd.f32 %v173_v14, %v158_v12  ;;  %v183_v18 = vrot.slane %v182_v15, 4 }
 0x102   :  { %v258_v19 = vpop.f32.mrf.mxu0 }
 0x103   :  { %v175_v20 = vrot.slane %v174_v17, 2  ;;  %v184_v21 = vadd.f32 %v183_v18, %v182_v15 }
 0x105   :  { %v176_v22 = vadd.f32 %v175_v20, %v174_v17  ;;  %v185_v23 = vrot.slane %v184_v21, 2 }
 0x107   :  { %v177_v24 = vrot.slane %v176_v22, 1  ;;  %v186_v25 = vadd.f32 %v185_v23, %v184_v21 }
 0x109   :  { %v178_v27 = vadd.f32 %v177_v24, %v176_v22  ;;  %v187_v28 = vrot.slane %v186_v25, 1 }
 0x10b   :  { %v179_v30 = vadd.f32 %v178_v27, %v172_v26  ;;  %v188_v31 = vadd.f32 %v187_v28, %v186_v25 }
 0x10d   :  { %180 = vst [vmem:[#allocation7] sm:$0x1] %v179_v30  ;;  %v189_v32 = vadd.f32 %v188_v31, %v181_v29 }
 0x10e   :  { %326 = shalt.err (!%p323_p0)
}
 0x10f   :  { %200 = dma.vmem_to_hbm [thread:$0]  %s198_s28, 16, %s414_s3, [#allocation4]   ;;  %190 = vst [vmem:[#allocation8] sm:$0x1] %v189_v32 }
 0x110   :  { %s335_s8 = scalar_lea.vmem %s208_s29, 16  ;;  %s339_s9 = scalar_lea.vmem %s208_s29, 32 }
 0x111   :  { %p336_p1 = scmp.ne.s32.totalorder %s208_s29, %s335_s8  ;;  %p340_p2 = scmp.lt.s32.totalorder %s208_s29, %s208_s29 }
 0x112   :  { %p341_p3 = scmp.lt.s32.totalorder %s339_s9, %s335_s8 }
 0x114   :  { %p342_p4 = por %p341_p3, %p340_p2 }
 0x116   :  { %p343_p5 = pnand %p342_p4, %p336_p1 }
 0x118   :  { %346 = shalt.err (!%p343_p5)
}
 0x119   :  { %210 = dma.vmem_to_hbm [thread:$0]  %s208_s29, 16, %s415_s4, [#allocation9]  }
 0x11a   :  { %359 = dma.done.wait [#allocation4], 16  }
 0x11b   :  { %360 = vsyncadd [#allocation4], 4294967280 }
 0x11c   :  { %361 = dma.done.wait [#allocation9], 16  }
 0x11d   :  { %362 = vsyncadd [#allocation9], 4294967280 }
 0x11e   :  { %217 = vsyncpa [#allocation3], 1 }
 0x11f   :  { %218 = vsyncpa [#allocation6], 1 }
 0x120   :  { %219 = vsyncpa [#allocation4], 1 }
 0x121   :  { %220 = vsyncpa [#allocation9], 1 }

</bundles_post_ra>
